<compile_context>
chip_gen: v7x
topology: tpu7x:2x2x1
jax: 0.10.0
libtpu: 0.0.40
codegen_flags: <defaults>
</compile_context>

<pallas_src>
import jax
import jax.numpy as jnp
from jax.experimental import pallas as pl
from jax.experimental.pallas import tpu as pltpu

BN_EPS = 1e-5
KSIZE = 4
_VMEM_LIMIT = 32 * 1024 * 1024


def _round_up(x, m):
    return ((x + m - 1) // m) * m


def _row_tile(rows, cols, bytes_per_block=2 * 1024 * 1024):
    """Sublane-aligned row tile keeping one (tile, cols) f32 block around ~2 MiB."""
    tm = max(8, min(512, (bytes_per_block // max(1, cols * 4)) // 8 * 8))
    if rows < tm:
        tm = _round_up(rows, 8)
    return tm


# ----------------------------- Pallas kernels ------------------------------ #

def _matmul_kernel(x_ref, w_ref, o_ref):
    # bf16 @ bf16 -> f32 on the MXU; one (tm, tn) lane-dense output tile.
    o_ref[...] = jnp.dot(x_ref[...], w_ref[...],
                         preferred_element_type=jnp.float32)


def _bn_reduce_kernel(x_ref, sum_ref, sq_ref):
    # Accumulate per-column sum / sum-of-squares across the (arbitrary) row grid.
    @pl.when(pl.program_id(0) == 0)
    def _():
        sum_ref[...] = jnp.zeros_like(sum_ref)
        sq_ref[...] = jnp.zeros_like(sq_ref)

    x = x_ref[...]
    sum_ref[...] += jnp.sum(x, axis=0, keepdims=True)
    sq_ref[...] += jnp.sum(x * x, axis=0, keepdims=True)


def _scale_shift_relu_kernel(x_ref, s_ref, b_ref, o_ref):
    o_ref[...] = jnp.maximum(x_ref[...] * s_ref[...] + b_ref[...], 0.0)


def _tanh_kernel(x_ref, o_ref):
    o_ref[...] = jnp.tanh(x_ref[...])


# --------------------------- pallas_call wrappers --------------------------- #

def _pallas_matmul(x_bf16, w_bf16, tm):
    mp, cin = x_bf16.shape
    _, np_ = w_bf16.shape
    if np_ <= 1024:
        tn = np_
    elif np_ % 1024 == 0:
        tn = 1024
    elif np_ % 512 == 0:
        tn = 512
    elif np_ % 256 == 0:
        tn = 256
    else:
        tn = 128                            # np_ is always a multiple of 128
    grid = (mp // tm, np_ // tn)
    cost = pl.CostEstimate(
        flops=2 * mp * cin * np_,
        transcendentals=0,
        bytes_accessed=mp * cin * 2 + cin * np_ * 2 + mp * np_ * 4,
    )
    return pl.pallas_call(
        _matmul_kernel,
        out_shape=jax.ShapeDtypeStruct((mp, np_), jnp.float32),
        grid=grid,
        in_specs=[
            pl.BlockSpec((tm, cin), lambda i, j: (i, 0)),
            pl.BlockSpec((cin, tn), lambda i, j: (0, j)),
        ],
        out_specs=pl.BlockSpec((tm, tn), lambda i, j: (i, j)),
        compiler_params=pltpu.CompilerParams(
            dimension_semantics=("parallel", "parallel"),
            vmem_limit_bytes=_VMEM_LIMIT),
        cost_estimate=cost,
    )(x_bf16, w_bf16)


def _pallas_bn_reduce(x2d, tm):
    rows_p, cols = x2d.shape
    return pl.pallas_call(
        _bn_reduce_kernel,
        out_shape=(jax.ShapeDtypeStruct((1, cols), jnp.float32),
                   jax.ShapeDtypeStruct((1, cols), jnp.float32)),
        grid=(rows_p // tm,),
        in_specs=[pl.BlockSpec((tm, cols), lambda i: (i, 0))],
        out_specs=(pl.BlockSpec((1, cols), lambda i: (0, 0)),
                   pl.BlockSpec((1, cols), lambda i: (0, 0))),
        compiler_params=pltpu.CompilerParams(
            dimension_semantics=("arbitrary",),
            vmem_limit_bytes=_VMEM_LIMIT),
    )(x2d)


def _pallas_scale_shift_relu(x2d, scale, shift, tm):
    rows_p, cols = x2d.shape
    return pl.pallas_call(
        _scale_shift_relu_kernel,
        out_shape=jax.ShapeDtypeStruct((rows_p, cols), jnp.float32),
        grid=(rows_p // tm,),
        in_specs=[pl.BlockSpec((tm, cols), lambda i: (i, 0)),
                  pl.BlockSpec((1, cols), lambda i: (0, 0)),
                  pl.BlockSpec((1, cols), lambda i: (0, 0))],
        out_specs=pl.BlockSpec((tm, cols), lambda i: (i, 0)),
        compiler_params=pltpu.CompilerParams(
            dimension_semantics=("parallel",),
            vmem_limit_bytes=_VMEM_LIMIT),
    )(x2d, scale, shift)


def _pallas_tanh(x2d, tm):
    rows_p, cols = x2d.shape
    return pl.pallas_call(
        _tanh_kernel,
        out_shape=jax.ShapeDtypeStruct((rows_p, cols), jnp.float32),
        grid=(rows_p // tm,),
        in_specs=[pl.BlockSpec((tm, cols), lambda i: (i, 0))],
        out_specs=pl.BlockSpec((tm, cols), lambda i: (i, 0)),
        compiler_params=pltpu.CompilerParams(
            dimension_semantics=("parallel",),
            vmem_limit_bytes=_VMEM_LIMIT),
    )(x2d)


# ------------------------------ layer glue ---------------------------------- #

def _conv_transpose(x_nhwc, wmat_bf16, cout, stride, pad):
    """ConvTranspose2d(k=4, stride, pad, bias=False) as X @ W' + col2im overlap-add."""
    b, h, w, cin = x_nhwc.shape
    k = KSIZE
    m = b * h * w
    tm = 512 if m >= 512 else _round_up(m, 8)
    mp = _round_up(m, tm)
    x2d = x_nhwc.reshape(m, cin).astype(jnp.bfloat16)
    if mp != m:
        x2d = jnp.pad(x2d, ((0, mp - m), (0, 0)))

    z = _pallas_matmul(x2d, wmat_bf16, tm)                     # (mp, Npad) f32
    z = z[:m, :k * k * cout].reshape(b, h, w, k, k, cout)

    # TODO(synk): col2im overlap-add stays in XLA (strided .at[].add); an in-kernel
    # version would need a manual DMA scatter that BlockSpec cannot express.
    hf = (h - 1) * stride + k
    wf = (w - 1) * stride + k
    out = jnp.zeros((b, hf, wf, cout), jnp.float32)
    for kh in range(k):
        for kw in range(k):
            out = out.at[:, kh:kh + (h - 1) * stride + 1:stride,
                         kw:kw + (w - 1) * stride + 1:stride, :].add(
                             z[:, :, :, kh, kw, :])
    return out[:, pad:hf - pad, pad:wf - pad, :]


def _batchnorm_relu(x_nhwc, gamma, beta):
    """Training-mode BatchNorm2d (batch stats, biased var) + ReLU, two tiled passes."""
    b, h, w, c = x_nhwc.shape
    n = b * h * w
    if (w * c) % 128 == 0:
        # Fold W into the lane axis: lane-dense without padding the channel dim.
        reps, rows, cols = w, b * h, w * c
        x2d = x_nhwc.reshape(rows, cols)
    else:
        cp = _round_up(c, 128)
        reps, rows, cols = 1, n, cp
        x2d = jnp.pad(x_nhwc.reshape(n, c), ((0, 0), (0, cp - c)))

    tm = _row_tile(rows, cols)
    rows_p = _round_up(rows, tm)
    if rows_p != rows:
        x2d = jnp.pad(x2d, ((0, rows_p - rows), (0, 0)))

    col_sum, col_sq = _pallas_bn_reduce(x2d, tm)
    if reps > 1:
        ch_sum = col_sum.reshape(reps, c).sum(axis=0)
        ch_sq = col_sq.reshape(reps, c).sum(axis=0)
    else:
        ch_sum = col_sum[0, :c]
        ch_sq = col_sq[0, :c]

    mean = ch_sum / n
    var = jnp.maximum(ch_sq / n - mean * mean, 0.0)            # biased var (PyTorch BN)
    scale_c = gamma * jax.lax.rsqrt(var + BN_EPS)
    shift_c = beta - mean * scale_c
    if reps > 1:
        scale = jnp.tile(scale_c, (reps,)).reshape(1, cols)
        shift = jnp.tile(shift_c, (reps,)).reshape(1, cols)
    else:
        scale = jnp.pad(scale_c, (0, cols - c)).reshape(1, cols)
        shift = jnp.pad(shift_c, (0, cols - c)).reshape(1, cols)

    y2d = _pallas_scale_shift_relu(x2d, scale, shift, tm)[:rows]
    if reps > 1:
        return y2d.reshape(b, h, w, c)
    return y2d[:, :c].reshape(b, h, w, c)


def _tanh_act(x):
    """Elementwise tanh as a tiled, lane-dense (rows, 128) Pallas pass."""
    shape = x.shape
    total = x.size
    cols = 128
    rows = -(-total // cols)
    tm = _row_tile(rows, cols)
    rows_p = _round_up(rows, tm)
    x2d = jnp.pad(x.reshape(-1), (0, rows_p * cols - total)).reshape(rows_p, cols)
    y2d = _pallas_tanh(x2d, tm)
    return y2d.reshape(-1)[:total].reshape(shape)


# ------------------------------ Generator ----------------------------------- #

def init_generator_params(key, n_input_noize_z=100, n_channels=3, n_fmaps=64):
    """Deterministic synthetic init matching the PyTorch module's shapes.

    Weight prep (transpose/reshape/lane-pad/bf16 cast) is hoisted here so the
    forward pass never re-materializes it.
    """
    specs = [
        (n_input_noize_z, n_fmaps * 8, 1, 0),  # 1  -> 4
        (n_fmaps * 8, n_fmaps * 4, 2, 1),      # 4  -> 8
        (n_fmaps * 4, n_fmaps * 2, 2, 1),      # 8  -> 16
        (n_fmaps * 2, n_fmaps, 2, 1),          # 16 -> 32
        (n_fmaps, n_channels, 2, 1),           # 32 -> 64
    ]
    params = []
    for i, (cin, cout, s, p) in enumerate(specs):
        key, sub = jax.random.split(key)
        w = jax.random.normal(sub, (cin, cout, KSIZE, KSIZE), jnp.float32) * 0.05
        # (Cin, Cout, K, K) -> (Cin, K*K*Cout), pad lanes to a multiple of 128, bf16.
        wmat = jnp.transpose(w, (0, 2, 3, 1)).reshape(cin, KSIZE * KSIZE * cout)
        npad = _round_up(KSIZE * KSIZE * cout, 128)
        wmat = jnp.pad(wmat, ((0, 0), (0, npad - KSIZE * KSIZE * cout)))
        wmat = wmat.astype(jnp.bfloat16)
        is_last = i == len(specs) - 1
        gamma = None if is_last else jnp.ones((cout,), jnp.float32)   # BN default weight
        beta = None if is_last else jnp.zeros((cout,), jnp.float32)   # BN default bias
        params.append({"wmat": wmat, "cout": cout, "stride": s, "pad": p,
                       "gamma": gamma, "beta": beta})
    return params


def generator_forward(x_nchw, params):
    x = jnp.transpose(x_nchw, (0, 2, 3, 1))      # NCHW -> NHWC
    for layer in params:
        y = _conv_transpose(x, layer["wmat"], layer["cout"],
                            layer["stride"], layer["pad"])
        if layer["gamma"] is not None:
            x = _batchnorm_relu(y, layer["gamma"], layer["beta"])
        else:
            x = _tanh_act(y)
    return jnp.transpose(x, (0, 3, 1, 2))        # NHWC -> NCHW


# --------------------------------- main -------------------------------------- #

if __name__ == "__main__":
    # Small configuration consistent with the module's constructor signature.
    B, NZ, NC, NF = 2, 16, 3, 8

    key = jax.random.PRNGKey(0)
    k_param, k_input = jax.random.split(key)

    params = init_generator_params(k_param, n_input_noize_z=NZ,
                                   n_channels=NC, n_fmaps=NF)

    # Noise input, PyTorch-style NCHW: (B, nz, 1, 1)
    z = jax.random.normal(k_input, (B, NZ, 1, 1), jnp.float32)

    out = generator_forward(z, params)
    out = jax.block_until_ready(out)

    assert out.shape == (B, NC, 64, 64), out.shape
    assert bool(jnp.all(jnp.isfinite(out)))
    assert bool(jnp.all(jnp.abs(out) <= 1.0))  # tanh output range

    print("KERNEL_OK")
</pallas_src>

<mosaic_0001>
module attributes {stable_mosaic.version = 11 : i64} {
  func.func @_matmul_kernel(%arg0: i32, %arg1: i32, %arg2: memref<8x16xbf16, #tpu.memory_space<vmem>>, %arg3: memref<16x1024xbf16, #tpu.memory_space<vmem>>, %arg4: memref<8x1024xf32, #tpu.memory_space<vmem>>) attributes {dimension_semantics = [#tpu.dimension_semantics<parallel>, #tpu.dimension_semantics<parallel>], iteration_bounds = array<i64: 1, 1>, scalar_prefetch = 0 : i64, scratch_operands = 0 : i64, tpu.core_type = #tpu.core_type<tc>, window_params = [{transform_indices = @transform_0, window_bounds = array<i64: 8, 16>}, {transform_indices = @transform_1, window_bounds = array<i64: 16, 1024>}, {transform_indices = @transform_2, window_bounds = array<i64: 8, 1024>}]} {
    %c0 = arith.constant 0 : index
    %c0_0 = arith.constant 0 : index
    %0 = vector.load %arg2[%c0, %c0_0] : memref<8x16xbf16, #tpu.memory_space<vmem>>, vector<8x16xbf16>
    %c0_1 = arith.constant 0 : index
    %c0_2 = arith.constant 0 : index
    %1 = vector.load %arg3[%c0_1, %c0_2] : memref<16x1024xbf16, #tpu.memory_space<vmem>>, vector<16x1024xbf16>
    %cst = arith.constant dense<0.000000e+00> : vector<8x1024xf32>
    %2 = tpu.matmul %0, %1, %cst {dimension_numbers = #tpu.dot_dimension_numbers<[1], [0], [0], [1], [0, 0, 1, 1], [], []>} : vector<8x16xbf16>, vector<16x1024xbf16>, vector<8x1024xf32> -> vector<8x1024xf32>
    %c0_3 = arith.constant 0 : index
    %c0_4 = arith.constant 0 : index
    %3 = vector.load %arg4[%c0_3, %c0_4] : memref<8x1024xf32, #tpu.memory_space<vmem>>, vector<8x1024xf32>
    tpu.vector_store %arg4[%c0_3, %c0_4], %2 {strides = array<i32>} : memref<8x1024xf32, #tpu.memory_space<vmem>>, vector<8x1024xf32>,
    return
  }
  func.func @transform_0(%arg0: i32, %arg1: i32) -> (i32, i32) {
    %c0_i32 = arith.constant 0 : i32
    %c0_i32_0 = arith.constant 0 : i32
    return %arg0, %c0_i32 : i32, i32
  }
  func.func @transform_1(%arg0: i32, %arg1: i32) -> (i32, i32) {
    %c0_i32 = arith.constant 0 : i32
    %c0_i32_0 = arith.constant 0 : i32
    return %c0_i32, %arg1 : i32, i32
  }
  func.func @transform_2(%arg0: i32, %arg1: i32) -> (i32, i32) {
    %c0_i32 = arith.constant 0 : i32
    return %arg0, %arg1 : i32, i32
  }
}

</mosaic_0001>

<bundles_post_ra>
// kernel: tpu_custom_call.1
= control target key start
LH: loop header
LB: loop body
LE: loop exit
PB: predicated region body
PF: predicated region fallthrough
CT: control target
= control target key end

     0   :  { %7 = vsyncpa [#allocation3], 0  ;;  %s434_s0 = inlined_call_operand.hbm [shape: bf16[8,16], index: 0, kind: input, shape index: {}]   ;;  %s435_s1 = inlined_call_operand.hbm [shape: bf16[16,1024], index: 1, kind: input, shape index: {}]   ;;  %s436_s2 = inlined_call_operand.hbm [shape: f32[8,1024], index: 2, kind: output, shape index: {}]  }
   0x1   :  { %8 = vsyncpa [#allocation6], 0 }
   0x2   :  { %9 = vsyncpa [#allocation4], 0  ;;  %s370_s9 = smov [#allocation2]   ;;  %s371_s11 = smov [#allocation5]  }
   0x3   :  { %s16_s10 = sshll.u32 %s370_s9, 4  ;;  %s25_s12 = sshll.u32 %s371_s11, 4  ;;  %s17_s10 = int_to_ptr.vmem [resolvable:$true] %s16_s10  ;;  %s391_s12 = int_to_ptr.vmem [resolvable:$true] %s25_s12 }
   0x4   :  { %s298_s15 = scalar_lea.hbm %s434_s0, 64 }
   0x5   :  { %p299_p0 = scmp.ne.s32.totalorder %s434_s0, %s298_s15  ;;  %p302_p1 = scmp.lt.u32.totalorder %s298_s15, %s434_s0 }
   0x7   :  { %p304_p2 = pnand %p302_p1, %p299_p0 }
   0x9   :  { %307 = shalt.err (!%p304_p2)
}
   0xa   :  { %s308_s20 = scalar_lea.vmem %s17_s10, 64  ;;  %p313_p4 = scmp.lt.s32.totalorder %s17_s10, %s17_s10 }
   0xb   :  { %p309_p3 = scmp.ne.s32.totalorder %s17_s10, %s308_s20  ;;  %p314_p5 = scmp.lt.s32.totalorder %s308_s20, %s308_s20 }
   0xd   :  { %p315_p6 = por %p314_p5, %p313_p4 }
   0xf   :  { %p316_p7 = pnand %p315_p6, %p309_p3 }
  0x11   :  { %319 = shalt.err (!%p316_p7)
}
  0x12   :  { %19 = dma.hbm_to_vmem [thread:$0]  %s434_s0, 64, %s17_s10, [#allocation3]  }
  0x13   :  { %s320_s25 = scalar_lea.hbm %s435_s1, 1024 }
  0x14   :  { %p321_p8 = scmp.ne.s32.totalorder %s435_s1, %s320_s25  ;;  %p324_p9 = scmp.lt.u32.totalorder %s320_s25, %s435_s1 }
  0x16   :  { %p326_p10 = pnand %p324_p9, %p321_p8 }
  0x18   :  { %329 = shalt.err (!%p326_p10)
}
  0x19   :  { %s330_s30 = scalar_lea.vmem %s391_s12, 1024  ;;  %p335_p12 = scmp.lt.s32.totalorder %s391_s12, %s391_s12 }
  0x1a   :  { %p331_p11 = scmp.ne.s32.totalorder %s391_s12, %s330_s30  ;;  %p336_p13 = scmp.lt.s32.totalorder %s330_s30, %s330_s30 }
  0x1c   :  { %p337_p0 = por %p336_p13, %p335_p12 }
  0x1e   :  { %p338_p1 = pnand %p337_p0, %p331_p11 }
  0x20   :  { %341 = shalt.err (!%p338_p1)
}
  0x21   :  { %s372_s0 = smov 512   ;;  %s373_s3 = smov 32  }
  0x22   :  { %31 = dma.hbm_to_vmem [thread:$0]  %s435_s1, 1024, %s391_s12, [#allocation6], %s372_s0, %s372_s0, %s373_s3  }
  0x23   :  { %364 = dma.done.wait [#allocation3], 64  }
  0x24   :  { %365 = vsyncadd [#allocation3], 4294967232 }
  0x25   :  { %366 = dma.done.wait [#allocation6], 1024  }
  0x26   :  { %367 = vsyncadd [#allocation6], 4294966272  ;;  %v374_v0 = vmov 0   ;;  %v40_v1 = vld [vmem:[#allocation5] sm:$0xff]  ;;  %v41_v3 = vld [vmem:[#allocation5 + $0x8] sm:$0xff]  ;;  %vm88_vm0 = vcmask 130048  }
  0x27   :  { %124 = vmatprep.mubr.bf16.mxu0 %v374_v0  ;;  %165 = vmatprep.mubr.bf16.mxu1 %v374_v0  ;;  %v44_v2 = vld [vmem:[#allocation5 + $0x20] sm:$0xff]  ;;  %v45_v5 = vld [vmem:[#allocation5 + $0x28] sm:$0xff]  ;;  %v42_v7 = vld [vmem:[#allocation5 + $0x10] sm:$0xff]  ;;  %s375_s1 = smov [#allocation7]  }
  0x28   :  { %v281_v4 = vcombine.high %v40_v1, %v44_v2  ;;  %v280_v6 = vcombine.low %v40_v1, %v44_v2  ;;  %v283_v8 = vcombine.high %v41_v3, %v45_v5  ;;  %v282_v9 = vcombine.low %v41_v3, %v45_v5  ;;  %v46_v10 = vld [vmem:[#allocation5 + $0x30] sm:$0xff]  ;;  %v43_v11 = vld [vmem:[#allocation5 + $0x18] sm:$0xff]  ;;  %s270_s6 = sshll.u32 %s375_s1, 4  ;;  %s271_s6 = int_to_ptr.vmem [resolvable:$true] %s270_s6 }
  0x29   :  { %v47_v12 = vld [vmem:[#allocation5 + $0x38] sm:$0xff]  ;;  %v285_v13 = vcombine.high %v42_v7, %v46_v10  ;;  %v284_v16 = vcombine.low %v42_v7, %v46_v10  ;;  %s342_s7 = scalar_lea.vmem %s271_s6, 1024  ;;  %p347_p3 = scmp.lt.s32.totalorder %s271_s6, %s271_s6 }
  0x2a   :  { %92 = vmatprep.subr.bf16.mxu0 %v281_v4  ;;  %v287_v14 = vcombine.high %v43_v11, %v47_v12  ;;  %133 = vmatprep.subr.bf16.mxu1 %v283_v8  ;;  %v39_v15 = vld [vmem:[#allocation2] sm:$0xf]  ;;  %v286_v17 = vcombine.low %v43_v11, %v47_v12  ;;  %p343_p2 = scmp.ne.s32.totalorder %s271_s6, %s342_s7  ;;  %p348_p4 = scmp.lt.s32.totalorder %s342_s7, %s342_s7 }
  0x2b   :  { %93 = vmatpush1.bf16.msra.mxu0 %v280_v6  ;;  %134 = vmatpush1.bf16.msra.mxu1 %v282_v9 }
  0x2c   :  { %174 = vmatprep.subr.bf16.mxu0 %v285_v13  ;;  %215 = vmatprep.subr.bf16.mxu1 %v287_v14  ;;  %p349_p5 = por %p348_p4, %p347_p3 }
  0x2e   :  { %288 = vmatmul.mubr.msk.bf16.vlgmr.msra.gmra.mrb[0].mxu0 %vm88_vm0, %v39_v15  ;;  %289 = vmatmul.mubr.msk.bf16.vlgmr.msra.gmra.mrb[0].mxu1 %vm88_vm0, %v39_v15  ;;  %p350_p6 = pnand %p349_p5, %p343_p2 }
  0x2f   :  { %175 = vmatpush1.bf16.msra.mxu0 %v284_v16  ;;  %216 = vmatpush1.bf16.msra.mxu1 %v286_v17 }
  0x30   :  { %206 = vmatprep.mubr.bf16.mxu0 %v374_v0  ;;  %247 = vmatprep.mubr.bf16.mxu1 %v374_v0 }
  0x36   :  { %290 = vmatmul.mubr.msk.bf16.vlgmr.msra.gmra.mrb[4].mxu0 %vm88_vm0, %v39_v15  ;;  %291 = vmatmul.mubr.msk.bf16.vlgmr.msra.gmra.mrb[4].mxu1 %vm88_vm0, %v39_v15 }
 0x101   :  { %v126_v18 = vpop.f32.mrb[0].mxu0  ;;  %v167_v19 = vpop.f32.mrb[0].mxu1 }
 0x102   :  { %256 = vst [vmem:[#allocation7] sm:$0xff] %v126_v18  ;;  %v128_v20 = vpop.f32.mrb[1].mxu0  ;;  %258 = vst [vmem:[#allocation7 + $0x10] sm:$0xff] %v167_v19  ;;  %v169_v21 = vpop.f32.mrb[1].mxu1 }
 0x103   :  { %257 = vst [vmem:[#allocation7 + $0x8] sm:$0xff] %v128_v20  ;;  %v130_v22 = vpop.f32.mrb[2].mxu0  ;;  %259 = vst [vmem:[#allocation7 + $0x18] sm:$0xff] %v169_v21  ;;  %v171_v23 = vpop.f32.mrb[2].mxu1 }
 0x104   :  { %v131_v24 = vpop.f32.mrb[3].mxu0  ;;  %v172_v25 = vpop.f32.mrb[3].mxu1 }
 0x109   :  { %v208_v26 = vpop.f32.mrb[4].mxu0  ;;  %v249_v27 = vpop.f32.mrb[4].mxu1 }
 0x10a   :  { %260 = vst [vmem:[#allocation7 + $0x20] sm:$0xff] %v208_v26  ;;  %v210_v28 = vpop.f32.mrb[5].mxu0  ;;  %262 = vst [vmem:[#allocation7 + $0x30] sm:$0xff] %v249_v27  ;;  %v251_v29 = vpop.f32.mrb[5].mxu1 }
 0x10b   :  { %261 = vst [vmem:[#allocation7 + $0x28] sm:$0xff] %v210_v28  ;;  %v212_v30 = vpop.f32.mrb[6].mxu0  ;;  %263 = vst [vmem:[#allocation7 + $0x38] sm:$0xff] %v251_v29  ;;  %v253_v31 = vpop.f32.mrb[6].mxu1 }
 0x10c   :  { %v213_v32 = vpop.f32.mrb[7].mxu0  ;;  %v254_v33 = vpop.f32.mrb[7].mxu1 }
 0x10d   :  { %353 = shalt.err (!%p350_p6)
}
 0x10e   :  { %s354_s10 = scalar_lea.hbm %s436_s2, 1024 }
 0x10f   :  { %p355_p7 = scmp.ne.s32.totalorder %s436_s2, %s354_s10  ;;  %p358_p8 = scmp.lt.u32.totalorder %s354_s10, %s436_s2 }
 0x111   :  { %p360_p9 = pnand %p358_p8, %p355_p7 }
 0x113   :  { %363 = shalt.err (!%p360_p9)
}
 0x114   :  { %273 = dma.vmem_to_hbm [thread:$0]  %s271_s6, 1024, %s436_s2, [#allocation4]  }
 0x115   :  { %368 = dma.done.wait [#allocation4], 1024  }
 0x116   :  { %369 = vsyncadd [#allocation4], 4294966272 }
 0x117   :  { %277 = vsyncpa [#allocation3], 1 }
 0x118   :  { %278 = vsyncpa [#allocation6], 1 }
 0x119   :  { %279 = vsyncpa [#allocation4], 1 }

</bundles_post_ra>
